<compile_context>
chip_gen: v5e
topology: v5e:2x2
jax: 0.10.0
libtpu: 0.0.40
codegen_flags: <defaults>
</compile_context>

<pallas_src>
import math

import jax
import jax.numpy as jnp
from jax.experimental import pallas as pl
from jax.experimental.pallas import tpu as pltpu

INPUT_SIZE = 784
HIDDEN_SIZE = 128
OUTPUT_SIZE = 10
LANE = 128      # lane-dense output width
SUBLANE = 16    # bf16-friendly sublane multiple for batch tiles


def _pad_to(in_feat, out_feat):
    # mirrors CustomLinear: 2 ** ceil(log2(max(in//2, out//2)))
    return 2 ** math.ceil(math.log2(max(in_feat // 2, out_feat // 2)))


def _round_up(x, m):
    return ((x + m - 1) // m) * m


def _dft_matrices(n, n_out):
    """Real/imag parts of the (n, n_out) truncated DFT matrix exp(-2*pi*i*j*k/n).

    Angles are reduced mod n so sin/cos arguments stay in [0, 2*pi).
    """
    j = jnp.arange(n, dtype=jnp.int32)[:, None]
    k = jnp.arange(n_out, dtype=jnp.int32)[None, :]
    ang = (-2.0 * jnp.pi / n) * ((j * k) % n).astype(jnp.float32)
    return jnp.cos(ang), jnp.sin(ang)


def _build_matrices(w1, w2):
    """Fold twiddle * truncated-DFT (complex) into two real matrices.

    Returns:
      W1: (784, 128) bf16 — interleaved (re,im) input rows -> [Hr | Hi] columns.
      W2: (128, 128) bf16 — [Hr | Hi] rows -> interleaved (re,im) output,
          zero-padded from 10 to 128 columns for lane-dense stores.
    """
    in1, out1 = INPUT_SIZE // 2, HIDDEN_SIZE // 2          # 392, 64
    out2 = OUTPUT_SIZE // 2                                 # 5
    pad1 = _pad_to(INPUT_SIZE, HIDDEN_SIZE)                 # 512
    pad2 = _pad_to(HIDDEN_SIZE, OUTPUT_SIZE)                # 64
    assert HIDDEN_SIZE // 2 == pad2                         # layer 2: no padding

    # ---- layer 1: diag(t1) @ DFT_512[:, :64], rows truncated to the 392
    # interleaved-input rows (rows 392..511 would multiply zero-padding). ----
    t1 = w1.reshape(pad1, 2)
    t1r, t1i = t1[:in1, 0], t1[:in1, 1]
    f1r, f1i = _dft_matrices(pad1, out1)
    f1r, f1i = f1r[:in1], f1i[:in1]
    g1r = t1r[:, None] * f1r - t1i[:, None] * f1i           # (392, 64)
    g1i = t1r[:, None] * f1i + t1i[:, None] * f1r           # (392, 64)
    w1_even = jnp.concatenate([g1r, g1i], axis=1)           # real-part input rows
    w1_odd = jnp.concatenate([-g1i, g1r], axis=1)           # imag-part input rows
    W1 = jnp.stack([w1_even, w1_odd], axis=1).reshape(2 * in1, 2 * out1)  # (784,128)

    # ---- layer 2: diag(t2) @ DFT_64[:, :5], output columns interleaved. ----
    t2 = w2.reshape(pad2, 2)
    t2r, t2i = t2[:, 0], t2[:, 1]
    f2r, f2i = _dft_matrices(pad2, out2)
    g2r = t2r[:, None] * f2r - t2i[:, None] * f2i           # (64, 5)
    g2i = t2r[:, None] * f2i + t2i[:, None] * f2r           # (64, 5)
    w2_hr = jnp.stack([g2r, g2i], axis=2).reshape(out1, OUTPUT_SIZE)   # Hr rows
    w2_hi = jnp.stack([-g2i, g2r], axis=2).reshape(out1, OUTPUT_SIZE)  # Hi rows
    W2 = jnp.concatenate([w2_hr, w2_hi], axis=0)            # (128, 10)
    W2 = jnp.pad(W2, ((0, 0), (0, LANE - OUTPUT_SIZE)))     # lane-dense (128, 128)

    return W1.astype(jnp.bfloat16), W2.astype(jnp.bfloat16)


def _mlp_kernel(x_ref, w1_ref, w2_ref, o_ref):
    # In-kernel f32 -> bf16 cast of the activation tile: avoids a separate
    # wrapper-side cast pass over HBM (the kernel is HBM-bound).
    x = x_ref[...].astype(jnp.bfloat16)
    h = jnp.dot(x, w1_ref[...], preferred_element_type=jnp.float32)
    # f32 ReLU then a single cast (cheapest formulation on v5e's f32-only VPU,
    # fine everywhere else; fully hidden under the DMA anyway).
    h = jnp.maximum(h, 0.0).astype(w2_ref.dtype)
    o = jnp.dot(h, w2_ref[...], preferred_element_type=jnp.float32)
    # bf16 lane-dense store: halves output write traffic, no masked vst.
    o_ref[...] = o.astype(o_ref.dtype)


def _pick_tiling(B, tile_b):
    """Pick (tile_b, padded_B).

    - tile_b is a multiple of 16 sublanes (bf16-safe second-to-last dim).
    - >= 2 grid steps whenever the batch allows (v7x megacore sharding).
    - capped at 2048 rows so double-buffered f32 input tiles (~12.8 MiB)
      stay well inside the default scoped-VMEM limit on v7x (and trivially
      on v5e/v6e's 128 MiB).
    - chosen to divide the 16-rounded batch, so no extra batch-padding copy.
    """
    if tile_b is not None:
        tile_b = _round_up(max(int(tile_b), SUBLANE), SUBLANE)
        return tile_b, _round_up(max(B, tile_b), tile_b)

    Bp = _round_up(max(B, SUBLANE), SUBLANE)
    if Bp <= SUBLANE:
        return Bp, Bp
    target = min(2048, _round_up(pl.cdiv(Bp, 2), SUBLANE))
    t = target
    while t >= SUBLANE:
        if Bp % t == 0:          # always terminates: 16 divides Bp
            return t, Bp
        t -= SUBLANE
    return target, _round_up(Bp, target)


def simple_mlp_forward(x, w1, w2, *, tile_b=None):
    """x: (B, INPUT_SIZE) f32. w1: (2*512,) f32. w2: (2*64,) f32.
    Returns (B, OUTPUT_SIZE, 1) f32, matching SimpleMLP.forward."""
    B = x.shape[0]
    in1, out1 = INPUT_SIZE // 2, HIDDEN_SIZE // 2

    W1, W2 = _build_matrices(w1, w2)

    tile_b, Bp = _pick_tiling(B, tile_b)
    xb = x.astype(jnp.float32)                 # no-op if already f32
    if Bp != B:
        xb = jnp.pad(xb, ((0, Bp - B), (0, 0)))

    n_tiles = Bp // tile_b

    flops = 2 * Bp * (2 * in1 * 2 * out1 + 2 * out1 * LANE)
    bytes_accessed = (Bp * 2 * in1 * 4          # x read (f32)
                      + 2 * in1 * 2 * out1 * 2  # W1 (bf16)
                      + 2 * out1 * LANE * 2     # W2 (bf16)
                      + Bp * LANE * 2)          # out write (bf16)

    out = pl.pallas_call(
        _mlp_kernel,
        out_shape=jax.ShapeDtypeStruct((Bp, LANE), jnp.bfloat16),
        grid=(n_tiles,),
        in_specs=[
            pl.BlockSpec((tile_b, 2 * in1), lambda i: (i, 0)),      # x tile (f32)
            pl.BlockSpec((2 * in1, 2 * out1), lambda i: (0, 0)),    # W1 resident
            pl.BlockSpec((2 * out1, LANE), lambda i: (0, 0)),       # W2 resident
        ],
        out_specs=pl.BlockSpec((tile_b, LANE), lambda i: (i, 0)),
        compiler_params=pltpu.CompilerParams(
            dimension_semantics=("parallel",)),
        cost_estimate=pl.CostEstimate(
            flops=flops, transcendentals=0, bytes_accessed=bytes_accessed),
    )(xb, W1, W2)

    # Drop batch padding, keep the 10 real output columns, restore f32 on the
    # tiny (B, 10) result, and match the module's (B, 10, 1) shape.
    return out[:B, :OUTPUT_SIZE].astype(jnp.float32).reshape(B, OUTPUT_SIZE, 1)


def reference_forward(x, w1, w2):
    """Pure-JAX reference mirroring the PyTorch module (uses jnp.fft.fft)."""
    B = x.shape[0]
    in1, out1 = INPUT_SIZE // 2, HIDDEN_SIZE // 2
    out2 = OUTPUT_SIZE // 2
    pad1 = _pad_to(INPUT_SIZE, HIDDEN_SIZE)
    pad2 = _pad_to(HIDDEN_SIZE, OUTPUT_SIZE)

    xc = x.reshape(B, in1, 2)
    xc = (xc[..., 0] + 1j * xc[..., 1]).astype(jnp.complex64)
    xc = jnp.pad(xc, ((0, 0), (0, pad1 - in1)))

    t1 = w1.reshape(pad1, 2)
    t1 = (t1[:, 0] + 1j * t1[:, 1]).astype(jnp.complex64)
    t2 = w2.reshape(pad2, 2)
    t2 = (t2[:, 0] + 1j * t2[:, 1]).astype(jnp.complex64)

    h = jnp.fft.fft(xc * t1[None, :], axis=-1)[:, :out1]
    h = jnp.maximum(h.real, 0.0) + 1j * jnp.maximum(h.imag, 0.0)
    o = jnp.fft.fft(h * t2[None, :], axis=-1)[:, :out2]
    return jnp.stack([o.real, o.imag], axis=-1).reshape(B, 2 * out2, 1)


if __name__ == "__main__":
    key = jax.random.PRNGKey(0)
    kx, k1, k2 = jax.random.split(key, 3)
    B = 2
    pad1 = _pad_to(INPUT_SIZE, HIDDEN_SIZE)
    pad2 = _pad_to(HIDDEN_SIZE, OUTPUT_SIZE)

    x = jax.random.normal(kx, (B, INPUT_SIZE), dtype=jnp.float32)
    w1 = jax.random.normal(k1, (2 * pad1,), dtype=jnp.float32)  # hidden twiddles
    w2 = jax.random.normal(k2, (2 * pad2,), dtype=jnp.float32)  # output twiddles

    fwd = jax.jit(simple_mlp_forward)
    out = jax.block_until_ready(fwd(x, w1, w2))
    ref = reference_forward(x, w1, w2)

    assert out.shape == (B, OUTPUT_SIZE, 1), out.shape
    # bf16 matmuls with f32 accumulation + bf16 output store: check error
    # scaled by output magnitude.
    max_err = float(jnp.max(jnp.abs(out - ref)))
    scale = float(jnp.max(jnp.abs(ref)))
    assert max_err <= 5e-2 * scale + 1e-2, (
        "max abs err = %f (scale %f)" % (max_err, scale))
    print("KERNEL_OK")
</pallas_src>

<mosaic_0001>
module attributes {stable_mosaic.version = 11 : i64} {
  func.func @_mlp_kernel(%arg0: i32, %arg1: memref<16x784xf32, #tpu.memory_space<vmem>>, %arg2: memref<784x128xbf16, #tpu.memory_space<vmem>>, %arg3: memref<128x128xbf16, #tpu.memory_space<vmem>>, %arg4: memref<16x128xbf16, #tpu.memory_space<vmem>>) attributes {dimension_semantics = [#tpu.dimension_semantics<parallel>], iteration_bounds = array<i64: 1>, scalar_prefetch = 0 : i64, scratch_operands = 0 : i64, tpu.core_type = #tpu.core_type<tc>, window_params = [{transform_indices = @transform_0, window_bounds = array<i64: 16, 784>}, {pipeline_mode = #tpu.pipeline_mode<synchronous>, transform_indices = @transform_1, window_bounds = array<i64: 784, 128>}, {pipeline_mode = #tpu.pipeline_mode<synchronous>, transform_indices = @transform_2, window_bounds = array<i64: 128, 128>}, {transform_indices = @transform_3, window_bounds = array<i64: 16, 128>}]} {
    %c0 = arith.constant 0 : index
    %c0_0 = arith.constant 0 : index
    %0 = vector.load %arg1[%c0, %c0_0] : memref<16x784xf32, #tpu.memory_space<vmem>>, vector<16x784xf32>
    %1 = arith.truncf %0 : vector<16x784xf32> to vector<16x784xbf16>
    %c0_1 = arith.constant 0 : index
    %c0_2 = arith.constant 0 : index
    %2 = vector.load %arg2[%c0_1, %c0_2] : memref<784x128xbf16, #tpu.memory_space<vmem>>, vector<784x128xbf16>
    %cst = arith.constant dense<0.000000e+00> : vector<16x128xf32>
    %3 = tpu.matmul %1, %2, %cst {dimension_numbers = #tpu.dot_dimension_numbers<[1], [0], [0], [1], [0, 0, 1, 1], [], []>} : vector<16x784xbf16>, vector<784x128xbf16>, vector<16x128xf32> -> vector<16x128xf32>
    %cst_3 = arith.constant 0.000000e+00 : f32
    %4 = vector.broadcast %cst_3 : f32 to vector<16x128xf32>
    %5 = arith.maximumf %3, %4 : vector<16x128xf32>
    %6 = arith.truncf %5 : vector<16x128xf32> to vector<16x128xbf16>
    %c0_4 = arith.constant 0 : index
    %c0_5 = arith.constant 0 : index
    %7 = vector.load %arg3[%c0_4, %c0_5] : memref<128x128xbf16, #tpu.memory_space<vmem>>, vector<128x128xbf16>
    %cst_6 = arith.constant dense<0.000000e+00> : vector<16x128xf32>
    %8 = tpu.matmul %6, %7, %cst_6 {dimension_numbers = #tpu.dot_dimension_numbers<[1], [0], [0], [1], [0, 0, 1, 1], [], []>} : vector<16x128xbf16>, vector<128x128xbf16>, vector<16x128xf32> -> vector<16x128xf32>
    %9 = arith.truncf %8 : vector<16x128xf32> to vector<16x128xbf16>
    %c0_7 = arith.constant 0 : index
    %c0_8 = arith.constant 0 : index
    %10 = vector.load %arg4[%c0_7, %c0_8] : memref<16x128xbf16, #tpu.memory_space<vmem>>, vector<16x128xbf16>
    tpu.vector_store %arg4[%c0_7, %c0_8], %9 {strides = array<i32>} : memref<16x128xbf16, #tpu.memory_space<vmem>>, vector<16x128xbf16>,
    return
  }
  func.func @transform_0(%arg0: i32) -> (i32, i32) {
    %c0_i32 = arith.constant 0 : i32
    %c0_i32_0 = arith.constant 0 : i32
    return %arg0, %c0_i32 : i32, i32
  }
  func.func @transform_1(%arg0: i32) -> (i32, i32) {
    %c0_i32 = arith.constant 0 : i32
    %c0_i32_0 = arith.constant 0 : i32
    %c0_i32_1 = arith.constant 0 : i32
    return %c0_i32, %c0_i32_0 : i32, i32
  }
  func.func @transform_2(%arg0: i32) -> (i32, i32) {
    %c0_i32 = arith.constant 0 : i32
    %c0_i32_0 = arith.constant 0 : i32
    %c0_i32_1 = arith.constant 0 : i32
    return %c0_i32, %c0_i32_0 : i32, i32
  }
  func.func @transform_3(%arg0: i32) -> (i32, i32) {
    %c0_i32 = arith.constant 0 : i32
    %c0_i32_0 = arith.constant 0 : i32
    return %arg0, %c0_i32 : i32, i32
  }
}

</mosaic_0001>

<bundles_post_ra>
// kernel: simple_mlp_forward.1
= control target key start
LH: loop header
LB: loop body
LE: loop exit
PB: predicated region body
PF: predicated region fallthrough
CT: control target
= control target key end

     0   :  { %vm428_vm0 = vcmask 130048   ;;  %s1146_s1 = inlined_call_operand.vmem [shape: bf16[784,128], index: 1, kind: input, shape index: {}]   ;;  %s1147_s0 = inlined_call_operand.vmem [shape: f32[16,784], index: 0, kind: input, shape index: {}]   ;;  %s1148_s2 = inlined_call_operand.vmem [shape: bf16[128,128], index: 2, kind: input, shape index: {}]   ;;  %s1149_s3 = inlined_call_operand.vmem [shape: bf16[16,128], index: 3, kind: output, shape index: {}]  }
   0x1   :  { %v855_v0 = vld [vmem:[%s1146_s1 + $0x38] sm:$0xff]  ;;  %v854_v4 = vld [vmem:[%s1146_s1 + $0x30] sm:$0xff]  ;;  %v853_v8 = vld [vmem:[%s1146_s1 + $0x28] sm:$0xff] }
   0x2   :  { %v863_v1 = vld [vmem:[%s1146_s1 + $0x78] sm:$0xff]  ;;  %432 = vmatpush.bf16.msra.mxu0 %v855_v0  ;;  %v862_v5 = vld [vmem:[%s1146_s1 + $0x70] sm:$0xff]  ;;  %v861_v9 = vld [vmem:[%s1146_s1 + $0x68] sm:$0xff] }
   0x3   :  { %v871_v2 = vld [vmem:[%s1146_s1 + $0xb8] sm:$0xff]  ;;  %446 = vmatpush.bf16.msra.mxu1 %v863_v1  ;;  %v870_v6 = vld [vmem:[%s1146_s1 + $0xb0] sm:$0xff]  ;;  %v869_v10 = vld [vmem:[%s1146_s1 + $0xa8] sm:$0xff] }
   0x4   :  { %v879_v3 = vld [vmem:[%s1146_s1 + $0xf8] sm:$0xff]  ;;  %460 = vmatpush.bf16.msra.mxu2 %v871_v2  ;;  %v878_v7 = vld [vmem:[%s1146_s1 + $0xf0] sm:$0xff]  ;;  %v877_v11 = vld [vmem:[%s1146_s1 + $0xe8] sm:$0xff] }
   0x5   :  { %474 = vmatpush.bf16.msra.mxu3 %v879_v3  ;;  %v852_v12 = vld [vmem:[%s1146_s1 + $0x20] sm:$0xff]  ;;  %v851_v16 = vld [vmem:[%s1146_s1 + $0x18] sm:$0xff]  ;;  %v850_v20 = vld [vmem:[%s1146_s1 + $0x10] sm:$0xff] }
   0x6   :  { %433 = vmatpush.bf16.msra.mxu0 %v854_v4  ;;  %v860_v13 = vld [vmem:[%s1146_s1 + $0x60] sm:$0xff]  ;;  %v859_v17 = vld [vmem:[%s1146_s1 + $0x58] sm:$0xff]  ;;  %v858_v21 = vld [vmem:[%s1146_s1 + $0x50] sm:$0xff] }
   0x7   :  { %447 = vmatpush.bf16.msra.mxu1 %v862_v5  ;;  %v868_v14 = vld [vmem:[%s1146_s1 + $0xa0] sm:$0xff]  ;;  %v867_v18 = vld [vmem:[%s1146_s1 + $0x98] sm:$0xff]  ;;  %v866_v22 = vld [vmem:[%s1146_s1 + $0x90] sm:$0xff] }
   0x8   :  { %461 = vmatpush.bf16.msra.mxu2 %v870_v6  ;;  %v876_v15 = vld [vmem:[%s1146_s1 + $0xe0] sm:$0xff]  ;;  %v875_v19 = vld [vmem:[%s1146_s1 + $0xd8] sm:$0xff]  ;;  %v874_v23 = vld [vmem:[%s1146_s1 + $0xd0] sm:$0xff] }
   0x9   :  { %475 = vmatpush.bf16.msra.mxu3 %v878_v7  ;;  %v849_v24 = vld [vmem:[%s1146_s1 + $0x8] sm:$0xff]  ;;  %v848_v28 = vld [vmem:[%s1146_s1] sm:$0xff]  ;;  %v887_v31 = vld [vmem:[%s1146_s1 + $0x138] sm:$0xff] }
   0xa   :  { %434 = vmatpush.bf16.msra.mxu0 %v853_v8  ;;  %v857_v25 = vld [vmem:[%s1146_s1 + $0x48] sm:$0xff]  ;;  %v856_v29 = vld [vmem:[%s1146_s1 + $0x40] sm:$0xff]  ;;  %v22_v33 = vld [vmem:[%s1147_s0 + $0x38] sm:$0xff] }
   0xb   :  { %448 = vmatpush.bf16.msra.mxu1 %v861_v9  ;;  %v865_v26 = vld [vmem:[%s1146_s1 + $0x88] sm:$0xff]  ;;  %v864_v30 = vld [vmem:[%s1146_s1 + $0x80] sm:$0xff]  ;;  %v895_v36 = vld [vmem:[%s1146_s1 + $0x178] sm:$0xff] }
   0xc   :  { %462 = vmatpush.bf16.msra.mxu2 %v869_v10  ;;  %v873_v27 = vld [vmem:[%s1146_s1 + $0xc8] sm:$0xff]  ;;  %v15_v32 = vld [vmem:[%s1147_s0] sm:$0xff]  ;;  %v17_v37 = vld [vmem:[%s1147_s0 + $0x10] sm:$0xff] }
   0xd   :  { %476 = vmatpush.bf16.msra.mxu3 %v877_v11  ;;  %v16_v34 = vld [vmem:[%s1147_s0 + $0x8] sm:$0xff]  ;;  %v23_v35 = vld [vmem:[%s1147_s0 + $0x40] sm:$0xff]  ;;  %v18_v40 = vld [vmem:[%s1147_s0 + $0x18] sm:$0xff]  ;;  %v29_v42 = vpack.c.bf16 %v22_v33, %v15_v32 }
   0xe   :  { %435 = vmatpush.bf16.msra.mxu0 %v852_v12  ;;  %v24_v38 = vld [vmem:[%s1147_s0 + $0x48] sm:$0xff]  ;;  %v872_v39 = vld [vmem:[%s1146_s1 + $0xc0] sm:$0xff]  ;;  %v25_v41 = vld [vmem:[%s1147_s0 + $0x50] sm:$0xff]  ;;  %v30_v43 = vpack.c.bf16 %v23_v35, %v16_v34 }
   0xf   :  { %449 = vmatpush.bf16.msra.mxu1 %v860_v13  ;;  %v31_v44 = vpack.c.bf16 %v24_v38, %v17_v37  ;;  %v886_v45 = vld [vmem:[%s1146_s1 + $0x130] sm:$0xff]  ;;  %v32_v46 = vpack.c.bf16 %v25_v41, %v18_v40  ;;  %v896_v48 = vld [vmem:[%s1146_s1 + $0x180] sm:$0xff]  ;;  %v885_v49 = vld [vmem:[%s1146_s1 + $0x128] sm:$0xff] }
  0x10   :  { %463 = vmatpush.bf16.msra.mxu2 %v868_v14  ;;  %v894_v47 = vld [vmem:[%s1146_s1 + $0x170] sm:$0xff]  ;;  %v893_v50 = vld [vmem:[%s1146_s1 + $0x168] sm:$0xff]  ;;  %v884_v51 = vld [vmem:[%s1146_s1 + $0x120] sm:$0xff] }
  0x11   :  { %477 = vmatpush.bf16.msra.mxu3 %v876_v15  ;;  %v892_v52 = vld [vmem:[%s1146_s1 + $0x160] sm:$0xff]  ;;  %v883_v53 = vld [vmem:[%s1146_s1 + $0x118] sm:$0xff]  ;;  %v21_v54 = vld [vmem:[%s1147_s0 + $0x30] sm:$0xff] }
  0x12   :  { %436 = vmatpush.bf16.msra.mxu0 %v851_v16  ;;  %v28_v55 = vld [vmem:[%s1147_s0 + $0x68] sm:$0xff]  ;;  %v891_v56 = vld [vmem:[%s1146_s1 + $0x158] sm:$0xff]  ;;  %v882_v58 = vld [vmem:[%s1146_s1 + $0x110] sm:$0xff] }
  0x13   :  { %450 = vmatpush.bf16.msra.mxu1 %v859_v17  ;;  %v35_v57 = vpack.c.bf16 %v28_v55, %v21_v54  ;;  %v890_v59 = vld [vmem:[%s1146_s1 + $0x150] sm:$0xff]  ;;  %v881_v60 = vld [vmem:[%s1146_s1 + $0x108] sm:$0xff]  ;;  %v880_v62 = vld [vmem:[%s1146_s1 + $0x100] sm:$0xff] }
  0x14   :  { %464 = vmatpush.bf16.msra.mxu2 %v867_v18  ;;  %v889_v61 = vld [vmem:[%s1146_s1 + $0x148] sm:$0xff]  ;;  %v19_v63 = vld [vmem:[%s1147_s0 + $0x20] sm:$0xff]  ;;  %v26_v0 = vld [vmem:[%s1147_s0 + $0x58] sm:$0xff] }
  0x15   :  { %478 = vmatpush.bf16.msra.mxu3 %v875_v19  ;;  %v888_v1 = vld [vmem:[%s1146_s1 + $0x140] sm:$0xff]  ;;  %v20_v2 = vld [vmem:[%s1147_s0 + $0x28] sm:$0xff]  ;;  %v33_v4 = vpack.c.bf16 %v26_v0, %v19_v63  ;;  %v904_v6 = vld [vmem:[%s1148_s2 + $0x38] sm:$0xff] }
  0x16   :  { %437 = vmatpush.bf16.msra.mxu0 %v850_v20  ;;  %v27_v3 = vld [vmem:[%s1147_s0 + $0x60] sm:$0xff]  ;;  %v903_v7 = vld [vmem:[%s1148_s2 + $0x30] sm:$0xff]  ;;  %v902_v8 = vld [vmem:[%s1148_s2 + $0x28] sm:$0xff] }
  0x17   :  { %451 = vmatpush.bf16.msra.mxu1 %v858_v21  ;;  %v34_v5 = vpack.c.bf16 %v27_v3, %v20_v2  ;;  %v901_v9 = vld [vmem:[%s1148_s2 + $0x20] sm:$0xff]  ;;  %v900_v10 = vld [vmem:[%s1148_s2 + $0x18] sm:$0xff]  ;;  %v899_v11 = vld [vmem:[%s1148_s2 + $0x10] sm:$0xff] }
  0x18   :  { %465 = vmatpush.bf16.msra.mxu2 %v866_v22  ;;  %v898_v12 = vld [vmem:[%s1148_s2 + $0x8] sm:$0xff]  ;;  %v897_v15 = vld [vmem:[%s1148_s2] sm:$0xff] }
  0x19   :  { %479 = vmatpush.bf16.msra.mxu3 %v874_v23 }
  0x1a   :  { %438 = vmatpush.bf16.msra.mxu0 %v849_v24 }
  0x1b   :  { %452 = vmatpush.bf16.msra.mxu1 %v857_v25 }
  0x1c   :  { %466 = vmatpush.bf16.msra.mxu2 %v865_v26 }
  0x1d   :  { %480 = vmatpush.bf16.msra.mxu3 %v873_v27 }
  0x1e   :  { %439 = vmatpush.bf16.msra.mxu0 %v848_v28 }
  0x1f   :  { %453 = vmatpush.bf16.msra.mxu1 %v856_v29 }
  0x20   :  { %467 = vmatpush.bf16.msra.mxu2 %v864_v30 }
  0x21   :  { %481 = vmatpush.bf16.msra.mxu3 %v872_v39  ;;  %440 = vmatmul.bf16.vlgmr.msra.gmra.mxu0 %v29_v42 }
  0x22   :  { %488 = vmatpush.bf16.msrb.mxu0 %v887_v31  ;;  %454 = vmatmul.bf16.vlgmr.msra.gmra.mxu1 %v30_v43 }
  0x23   :  { %502 = vmatpush.bf16.msrb.mxu1 %v895_v36  ;;  %468 = vmatmul.bf16.vlgmr.msra.gmra.mxu2 %v31_v44 }
  0x24   :  { %482 = vmatmul.bf16.vlgmr.msra.gmra.mxu3 %v32_v46  ;;  %523 = vmatpush.bf16.msrb.mxu2 %v896_v48 }
  0x25   :  { %597 = vmatpush.bf16.msrb.mxu3 %v904_v6 }
  0x26   :  { %489 = vmatpush.bf16.msrb.mxu0 %v886_v45 }
  0x27   :  { %503 = vmatpush.bf16.msrb.mxu1 %v894_v47 }
  0x29   :  { %598 = vmatpush.bf16.msrb.mxu3 %v903_v7 }
  0x2a   :  { %490 = vmatpush.bf16.msrb.mxu0 %v885_v49 }
  0x2b   :  { %504 = vmatpush.bf16.msrb.mxu1 %v893_v50 }
  0x2d   :  { %599 = vmatpush.bf16.msrb.mxu3 %v902_v8 }
  0x2e   :  { %491 = vmatpush.bf16.msrb.mxu0 %v884_v51 }
  0x2f   :  { %505 = vmatpush.bf16.msrb.mxu1 %v892_v52 }
  0x31   :  { %600 = vmatpush.bf16.msrb.mxu3 %v901_v9 }
  0x32   :  { %492 = vmatpush.bf16.msrb.mxu0 %v883_v53 }
  0x33   :  { %506 = vmatpush.bf16.msrb.mxu1 %v891_v56  ;;  %815 = vmatmul.msk.bf16.vlgmr.msrb.gmra.mxu2 %vm428_vm0, %v35_v57 }
  0x35   :  { %601 = vmatpush.bf16.msrb.mxu3 %v900_v10 }
  0x36   :  { %493 = vmatpush.bf16.msrb.mxu0 %v882_v58 }
  0x37   :  { %507 = vmatpush.bf16.msrb.mxu1 %v890_v59 }
  0x39   :  { %602 = vmatpush.bf16.msrb.mxu3 %v899_v11 }
  0x3a   :  { %494 = vmatpush.bf16.msrb.mxu0 %v881_v60 }
  0x3b   :  { %508 = vmatpush.bf16.msrb.mxu1 %v889_v61 }
  0x3d   :  { %603 = vmatpush.bf16.msrb.mxu3 %v898_v12 }
  0x3e   :  { %495 = vmatpush.bf16.msrb.mxu0 %v880_v62 }
  0x3f   :  { %509 = vmatpush.bf16.msrb.mxu1 %v888_v1 }
  0x41   :  { %496 = vmatmul.bf16.vlgmr.msrb.gmra.mxu0 %v33_v4  ;;  %604 = vmatpush.bf16.msrb.mxu3 %v897_v15 }
  0x42   :  { %510 = vmatmul.bf16.vlgmr.msrb.gmra.mxu1 %v34_v5 }
  0x9e   :  { %v441_v13 = vpop.f32.mrf.mxu0 }
  0x9f   :  { %v455_v14 = vpop.f32.mrf.mxu1 }
  0xa0   :  { %v456_v18 = vadd.f32 %v455_v14, %v441_v13 }
  0xa6   :  { %v469_v16 = vpop.f32.mrf.mxu2  ;;  %v443_v17 = vpop.f32.mrf.mxu0 }
  0xa7   :  { %v457_v19 = vpop.f32.mrf.mxu1  ;;  %v483_v20 = vpop.f32.mrf.mxu3  ;;  %v470_v22 = vadd.f32 %v469_v16, %v456_v18 }
  0xa8   :  { %v458_v23 = vadd.f32 %v457_v19, %v443_v17 }
  0xa9   :  { %v484_v25 = vadd.f32 %v483_v20, %v470_v22 }
  0xae   :  { %v471_v21 = vpop.f32.mrf.mxu2 }
  0xaf   :  { %v472_v28 = vadd.f32 %v471_v21, %v458_v23  ;;  %v485_v30 = vpop.f32.mrf.mxu3 }
  0xb1   :  { %v486_v31 = vadd.f32 %v485_v30, %v472_v28 }
  0xb6   :  { %v525_v27 = vpop.f32.mrf.mxu2 }
  0xbe   :  { %v497_v24 = vpop.f32.mrf.mxu0  ;;  %v527_v38 = vpop.f32.mrf.mxu2 }
  0xbf   :  { %v511_v26 = vpop.f32.mrf.mxu1  ;;  %v498_v29 = vadd.f32 %v497_v24, %v484_v25 }
  0xc1   :  { %v512_v32 = vadd.f32 %v511_v26, %v498_v29 }
  0xc3   :  { %v526_v36 = vadd.f32 %v525_v27, %v512_v32 }
  0xc5   :  { %v530_v40 = vmax.f32 %v526_v36, 0.0 }
  0xc6   :  { %v499_v33 = vpop.f32.mrf.mxu0 }
  0xc7   :  { %v500_v34 = vadd.f32 %v499_v33, %v486_v31  ;;  %v513_v35 = vpop.f32.mrf.mxu1 }
  0xc9   :  { %v514_v37 = vadd.f32 %v513_v35, %v500_v34 }
  0xcb   :  { %v528_v39 = vadd.f32 %v527_v38, %v514_v37 }
  0xcd   :  { %v531_v41 = vmax.f32 %v528_v39, 0.0 }
  0xcf   :  { %v532_v42 = vpack.c.bf16 %v531_v41, %v530_v40 }
  0xd1   :  { %605 = vmatmul.bf16.vlgmr.msrb.gmra.mxu3 %v532_v42 }
 0x154   :  { %v606_v43 = vpop.f32.mrf.mxu3 }
 0x15c   :  { %v608_v44 = vpop.f32.mrf.mxu3 }
 0x15d   :  { %v908_v45 = vpack.c.bf16 %v608_v44, %v606_v43 }
 0x15f   :  { %909 = vst [vmem:[%s1149_s3] sm:$0xff] %v908_v45  }

</bundles_post_ra>
